<compile_context>
chip_gen: v7x
topology: tpu7x:2x2x1
jax: 0.10.0
libtpu: 0.0.40
codegen_flags: <defaults>
</compile_context>

<pallas_src>
import jax
import jax.numpy as jnp
from jax.experimental import pallas as pl
from jax.experimental.pallas import tpu as pltpu


def _round_up(x, m):
    return ((x + m - 1) // m) * m


def _pick_tile(padded_dim, max_tile, align):
    # padded_dim and max_tile are multiples of `align`; returns the largest tile
    # <= max_tile that evenly divides padded_dim (minimizes padding, keeps blocks aligned).
    t = min(max_tile, padded_dim)
    while padded_dim % t:
        t -= align
    return t


def _csl_kernel(x_ref, wT_ref, vec_ref, t_ref, o_ref):
    # x_ref:  (tm, Din)      matmul dtype (f32 or bf16)
    # wT_ref: (Din, tn)      matmul dtype
    # vec_ref:(4, tn) f32    rows = [layer_b, gate_w, gate_b, hbias_w]
    # t_ref:  (tm, 1) f32
    # o_ref:  (tm, tn) f32
    h = jnp.dot(x_ref[...], wT_ref[...], preferred_element_type=jnp.float32)  # MXU, f32 acc
    t = t_ref[...]                               # (tm, 1)
    b = vec_ref[0:1, :]
    wg = vec_ref[1:2, :]
    bg = vec_ref[2:3, :]
    wb = vec_ref[3:4, :]
    gate = jax.nn.sigmoid(t * wg + bg)           # f32 VPU/EUP epilogue
    o_ref[...] = ((h + b) * gate + t * wb).astype(o_ref.dtype)


def init_params(key, dim_in, dim_out):
    """Same init distribution as nn.Linear (uniform(-1/sqrt(fan_in), 1/sqrt(fan_in))),
    but the main weight is stored already transposed as (dim_in, dim_out)."""
    k1, k2, k3, k4, k5 = jax.random.split(key, 5)
    lim = 1.0 / jnp.sqrt(dim_in)
    return {
        "layer_wT": jax.random.uniform(k1, (dim_in, dim_out), jnp.float32, -lim, lim),
        "layer_b": jax.random.uniform(k2, (dim_out,), jnp.float32, -lim, lim),
        "gate_w": jax.random.uniform(k3, (dim_out,), jnp.float32, -1.0, 1.0),  # fan_in = 1
        "gate_b": jax.random.uniform(k4, (dim_out,), jnp.float32, -1.0, 1.0),
        "hbias_w": jax.random.uniform(k5, (dim_out,), jnp.float32, -1.0, 1.0),
    }


def prepare_kernel_params(params, *, tn_max=256, matmul_dtype=jnp.float32):
    """One-time packing/padding of the weights (call OUTSIDE the training/ODE loop):
    pads Dout to a multiple of 128, packs the four bias/gate vectors into one (4, Dout_p)
    array, and optionally casts the matmul weight to bf16 (f32 accumulation in-kernel)."""
    wT = params["layer_wT"]
    din, dout = wT.shape
    dout_p = _round_up(dout, 128)
    tn = _pick_tile(dout_p, _round_up(tn_max, 128), 128)
    pad = dout_p - dout
    wT_p = jnp.pad(wT, ((0, 0), (0, pad))).astype(matmul_dtype)
    vecs = jnp.stack([params["layer_b"], params["gate_w"],
                      params["gate_b"], params["hbias_w"]]).astype(jnp.float32)  # (4, Dout)
    vecs_p = jnp.pad(vecs, ((0, 0), (0, pad)))
    return {
        "wT": wT_p,                  # (Din, Dout_p)
        "vecs": vecs_p,              # (4, Dout_p)
        "dim_out": dout,
        "tn": tn,
        "matmul_dtype": matmul_dtype,
    }


def concat_squash_linear(t, x, kp, *, tm_max=256):
    """t: (B,) or (B,1) f32; x: (B, Din) f32; kp: prepare_kernel_params(...).
    Returns (B, dim_out) f32.  On v5e prefer tm_max=128 (and tn_max=128 in prepare)."""
    B, Din = x.shape
    wT, vecs = kp["wT"], kp["vecs"]
    dout, tn = kp["dim_out"], kp["tn"]
    dout_p = wT.shape[1]
    matmul_dtype = kp["matmul_dtype"]

    # Pad batch to a sublane-aligned size and pick a batch tile that divides it.
    Bp = _round_up(B, 8)
    tm = _pick_tile(Bp, _round_up(tm_max, 8), 8)

    t2 = t.reshape(-1, 1).astype(jnp.float32)
    if Bp != B:
        x = jnp.pad(x, ((0, Bp - B), (0, 0)))
        t2 = jnp.pad(t2, ((0, Bp - B), (0, 0)))
    x = x.astype(matmul_dtype)

    grid = (Bp // tm, dout_p // tn)

    mm_item = jnp.dtype(matmul_dtype).itemsize
    cost = pl.CostEstimate(
        flops=2 * Bp * Din * dout_p,
        transcendentals=Bp * dout_p,  # sigmoid + exp path
        bytes_accessed=mm_item * (Bp * Din + Din * dout_p)
        + 4 * (Bp * dout_p + 4 * dout_p + Bp),
    )

    out_p = pl.pallas_call(
        _csl_kernel,
        out_shape=jax.ShapeDtypeStruct((Bp, dout_p), jnp.float32),
        grid=grid,
        in_specs=[
            pl.BlockSpec((tm, Din), lambda i, j: (i, 0)),   # x tile (full K)
            pl.BlockSpec((Din, tn), lambda i, j: (0, j)),   # W^T tile
            pl.BlockSpec((4, tn), lambda i, j: (0, j)),     # packed [b, wg, bg, wb]
            pl.BlockSpec((tm, 1), lambda i, j: (i, 0)),     # t column
        ],
        out_specs=pl.BlockSpec((tm, tn), lambda i, j: (i, j)),
        compiler_params=pltpu.CompilerParams(
            dimension_semantics=("parallel", "parallel"),   # megacore sharding on v7x
            vmem_limit_bytes=32 * 1024 * 1024,              # safe on v5e/v6e/v7x for these tiles
        ),
        cost_estimate=cost,
    )(x, wT, vecs, t2)

    if (Bp, dout_p) != (B, dout):
        out_p = out_p[:B, :dout]
    return out_p


def _reference(t, x, params):
    h = x @ params["layer_wT"] + params["layer_b"]
    tt = t.reshape(-1, 1)
    gate = jax.nn.sigmoid(tt * params["gate_w"] + params["gate_b"])
    return h * gate + tt * params["hbias_w"]


if __name__ == "__main__":
    batch, dim_in, dim_out = 8, 32, 64
    key = jax.random.PRNGKey(0)
    k_params, k_x, k_t = jax.random.split(key, 3)
    params = init_params(k_params, dim_in, dim_out)
    x = jax.random.normal(k_x, (batch, dim_in), jnp.float32)
    t = jax.random.uniform(k_t, (batch,), jnp.float32)

    ref = _reference(t, x, params)

    # f32-input MXU path (bit-accurate vs. reference).
    kp32 = prepare_kernel_params(params, matmul_dtype=jnp.float32)
    out32 = concat_squash_linear(t, x, kp32)
    jax.block_until_ready(out32)
    assert out32.shape == (batch, dim_out)
    assert jnp.allclose(out32, ref, atol=1e-5, rtol=1e-5)

    # bf16-input MXU path with f32 accumulation (fast path on v6e/v7x).
    kpbf16 = prepare_kernel_params(params, matmul_dtype=jnp.bfloat16)
    outbf16 = concat_squash_linear(t, x, kpbf16)
    jax.block_until_ready(outbf16)
    assert outbf16.shape == (batch, dim_out)
    assert jnp.allclose(outbf16, ref, atol=5e-2, rtol=5e-2)

    print("KERNEL_OK")
</pallas_src>

<mosaic_0001>
module attributes {stable_mosaic.version = 11 : i64} {
  func.func @_csl_kernel(%arg0: i32, %arg1: i32, %arg2: memref<8x32xf32, #tpu.memory_space<vmem>>, %arg3: memref<32x128xf32, #tpu.memory_space<vmem>>, %arg4: memref<4x128xf32, #tpu.memory_space<vmem>>, %arg5: memref<8x1xf32, #tpu.memory_space<vmem>>, %arg6: memref<8x128xf32, #tpu.memory_space<vmem>>) attributes {dimension_semantics = [#tpu.dimension_semantics<parallel>, #tpu.dimension_semantics<parallel>], iteration_bounds = array<i64: 1, 1>, scalar_prefetch = 0 : i64, scratch_operands = 0 : i64, tpu.core_type = #tpu.core_type<tc>, window_params = [{transform_indices = @transform_0, window_bounds = array<i64: 8, 32>}, {transform_indices = @transform_1, window_bounds = array<i64: 32, 128>}, {transform_indices = @transform_2, window_bounds = array<i64: 4, 128>}, {transform_indices = @transform_3, window_bounds = array<i64: 8, 1>}, {transform_indices = @transform_4, window_bounds = array<i64: 8, 128>}]} {
    %c0 = arith.constant 0 : index
    %c0_0 = arith.constant 0 : index
    %0 = vector.load %arg2[%c0, %c0_0] : memref<8x32xf32, #tpu.memory_space<vmem>>, vector<8x32xf32>
    %c0_1 = arith.constant 0 : index
    %c0_2 = arith.constant 0 : index
    %1 = vector.load %arg3[%c0_1, %c0_2] : memref<32x128xf32, #tpu.memory_space<vmem>>, vector<32x128xf32>
    %cst = arith.constant dense<0.000000e+00> : vector<8x128xf32>
    %2 = tpu.matmul %0, %1, %cst {dimension_numbers = #tpu.dot_dimension_numbers<[1], [0], [0], [1], [0, 0, 1, 1], [], []>} : vector<8x32xf32>, vector<32x128xf32>, vector<8x128xf32> -> vector<8x128xf32>
    %c0_3 = arith.constant 0 : index
    %c0_4 = arith.constant 0 : index
    %3 = vector.load %arg5[%c0_3, %c0_4] : memref<8x1xf32, #tpu.memory_space<vmem>>, vector<8x1xf32>
    %c0_5 = arith.constant 0 : index
    %c0_6 = arith.constant 0 : index
    %4 = vector.load %arg4[%c0_5, %c0_6] : memref<4x128xf32, #tpu.memory_space<vmem>>, vector<1x128xf32>
    %c1 = arith.constant 1 : index
    %c0_7 = arith.constant 0 : index
    %5 = vector.load %arg4[%c1, %c0_7] : memref<4x128xf32, #tpu.memory_space<vmem>>, vector<1x128xf32>
    %c2 = arith.constant 2 : index
    %c0_8 = arith.constant 0 : index
    %6 = vector.load %arg4[%c2, %c0_8] : memref<4x128xf32, #tpu.memory_space<vmem>>, vector<1x128xf32>
    %c3 = arith.constant 3 : index
    %c0_9 = arith.constant 0 : index
    %7 = vector.load %arg4[%c3, %c0_9] : memref<4x128xf32, #tpu.memory_space<vmem>>, vector<1x128xf32>
    %8 = vector.broadcast %3 : vector<8x1xf32> to vector<8x128xf32>
    %9 = vector.broadcast %5 : vector<1x128xf32> to vector<8x128xf32>
    %10 = arith.mulf %8, %9 : vector<8x128xf32>
    %11 = vector.broadcast %6 : vector<1x128xf32> to vector<8x128xf32>
    %12 = arith.addf %10, %11 : vector<8x128xf32>
    %13 = arith.negf %12 : vector<8x128xf32>
    %14 = math.exp %13 : vector<8x128xf32>
    %cst_10 = arith.constant 1.000000e+00 : f32
    %15 = vector.broadcast %cst_10 : f32 to vector<8x128xf32>
    %16 = arith.addf %15, %14 : vector<8x128xf32>
    %17 = arith.divf %15, %16 : vector<8x128xf32>
    %18 = vector.broadcast %4 : vector<1x128xf32> to vector<8x128xf32>
    %19 = arith.addf %2, %18 : vector<8x128xf32>
    %20 = arith.mulf %19, %17 : vector<8x128xf32>
    %21 = vector.broadcast %3 : vector<8x1xf32> to vector<8x128xf32>
    %22 = vector.broadcast %7 : vector<1x128xf32> to vector<8x128xf32>
    %23 = arith.mulf %21, %22 : vector<8x128xf32>
    %24 = arith.addf %20, %23 : vector<8x128xf32>
    %c0_11 = arith.constant 0 : index
    %c0_12 = arith.constant 0 : index
    %25 = vector.load %arg6[%c0_11, %c0_12] : memref<8x128xf32, #tpu.memory_space<vmem>>, vector<8x128xf32>
    tpu.vector_store %arg6[%c0_11, %c0_12], %24 {strides = array<i32>} : memref<8x128xf32, #tpu.memory_space<vmem>>, vector<8x128xf32>,
    return
  }
  func.func @transform_0(%arg0: i32, %arg1: i32) -> (i32, i32) {
    %c0_i32 = arith.constant 0 : i32
    %c0_i32_0 = arith.constant 0 : i32
    return %arg0, %c0_i32 : i32, i32
  }
  func.func @transform_1(%arg0: i32, %arg1: i32) -> (i32, i32) {
    %c0_i32 = arith.constant 0 : i32
    %c0_i32_0 = arith.constant 0 : i32
    return %c0_i32, %arg1 : i32, i32
  }
  func.func @transform_2(%arg0: i32, %arg1: i32) -> (i32, i32) {
    %c0_i32 = arith.constant 0 : i32
    %c0_i32_0 = arith.constant 0 : i32
    return %c0_i32, %arg1 : i32, i32
  }
  func.func @transform_3(%arg0: i32, %arg1: i32) -> (i32, i32) {
    %c0_i32 = arith.constant 0 : i32
    %c0_i32_0 = arith.constant 0 : i32
    return %arg0, %c0_i32 : i32, i32
  }
  func.func @transform_4(%arg0: i32, %arg1: i32) -> (i32, i32) {
    %c0_i32 = arith.constant 0 : i32
    return %arg0, %arg1 : i32, i32
  }
}

</mosaic_0001>

<bundles_post_ra>
// kernel: tpu_custom_call.1
= control target key start
LH: loop header
LB: loop body
LE: loop exit
PB: predicated region body
PF: predicated region fallthrough
CT: control target
= control target key end

     0   :  { %9 = vsyncpa [#allocation3], 0  ;;  %s328_s0 = inlined_call_operand.vmem [shape: f32[8,32], index: 0, kind: input, shape index: {}]   ;;  %s329_s1 = inlined_call_operand.hbm [shape: f32[32,128], index: 1, kind: input, shape index: {}]   ;;  %s330_s2 = inlined_call_operand.vmem [shape: f32[4,128], index: 2, kind: input, shape index: {}]   ;;  %s331_s3 = inlined_call_operand.vmem [shape: f32[8,1], index: 3, kind: input, shape index: {}]   ;;  %s332_s4 = inlined_call_operand.hbm [shape: f32[8,128], index: 4, kind: output, shape index: {}]  }
   0x1   :  { %10 = vsyncpa [#allocation4], 0  ;;  %s253_s15 = smov [#allocation2]   ;;  %s205_s19 = scalar_lea.hbm %s329_s1, 512 }
   0x2   :  { %s18_s16 = sshll.u32 %s253_s15, 4  ;;  %p206_p0 = scmp.ne.s32.totalorder %s329_s1, %s205_s19  ;;  %s19_s16 = int_to_ptr.vmem [resolvable:$true] %s18_s16 }
   0x3   :  { %p209_p1 = scmp.lt.u32.totalorder %s205_s19, %s329_s1 }
   0x5   :  { %p211_p2 = pnand %p209_p1, %p206_p0 }
   0x7   :  { %214 = shalt.err (!%p211_p2)
}
   0x8   :  { %s215_s24 = scalar_lea.vmem %s19_s16, 512  ;;  %p220_p4 = scmp.lt.s32.totalorder %s19_s16, %s19_s16 }
   0x9   :  { %p216_p3 = scmp.ne.s32.totalorder %s19_s16, %s215_s24  ;;  %p221_p5 = scmp.lt.s32.totalorder %s215_s24, %s215_s24 }
   0xb   :  { %p222_p6 = por %p221_p5, %p220_p4 }
   0xd   :  { %p223_p7 = pnand %p222_p6, %p216_p3 }
   0xf   :  { %226 = shalt.err (!%p223_p7)
}
  0x10   :  { %s254_s25 = smov 128   ;;  %s255_s26 = smov 8  }
  0x11   :  { %24 = dma.hbm_to_vmem [thread:$0]  %s329_s1, 512, %s19_s16, [#allocation3], %s254_s25, %s254_s25, %s255_s26  }
  0x12   :  { %249 = dma.done.wait [#allocation3], 512  }
  0x13   :  { %250 = vsyncadd [#allocation3], 4294966784  ;;  %v256_v0 = vmov 0.0|0.0   ;;  %vm257_vm0 = vmmov 0   ;;  %v258_v1 = vmov 0.0   ;;  %v259_v2 = vmov 0  }
  0x14   :  { %186 = vmatprep.subr.bf16.mxu0 %v256_v0  ;;  %183 = vmatprep.mubr.msk.f32.mxu0 %vm257_vm0, %v258_v1  ;;  %v33_v3 = vld [vmem:[#allocation2] sm:$0xff]  ;;  %v34_v4 = vld [vmem:[#allocation2 + $0x8] sm:$0xff]  ;;  %v35_v5 = vld [vmem:[#allocation2 + $0x10] sm:$0xff]  ;;  %vm67_vm1 = vcmask 261120   ;;  %s260_s12 = smov [#allocation5]  }
  0x15   :  { %200 = vset.pattern.permute.xlu0 %v259_v2  ;;  %v187_v6 = vpack.c.bf16 %v34_v4, %v33_v3  ;;  %v36_v7 = vld [vmem:[#allocation2 + $0x18] sm:$0xff]  ;;  %v37_v8 = vld [vmem:[%s331_s3] sm:$0xff]  ;;  %s155_s13 = sshll.u32 %s260_s12, 4  ;;  %s156_s13 = int_to_ptr.vmem [resolvable:$true] %s155_s13 }
  0x16   :  { %44 = vperm.xlu0 %200, %v37_v8   ;;  %v190_v9 = vpack.c.bf16 %v36_v7, %v35_v5  ;;  %v32_v10 = vld [vmem:[%s328_s0] sm:$0xff]  ;;  %s227_s14 = scalar_lea.vmem %s156_s13, 128  ;;  %p232_p9 = scmp.lt.s32.totalorder %s156_s13, %s156_s13 }
  0x17   :  { %188 = vmatpush3.bf16.msra.mxu0 %v187_v6  ;;  %v164_v11 = vld [vmem:[%s330_s2 + $0x1] ss:$0 sm:$0xff]  ;;  %v165_v14 = vld [vmem:[%s330_s2 + $0x2] ss:$0 sm:$0xff]  ;;  %v167_v19 = vld [vmem:[%s330_s2] ss:$0 sm:$0xff]  ;;  %p228_p8 = scmp.ne.s32.totalorder %s156_s13, %s227_s14  ;;  %p233_p10 = scmp.lt.s32.totalorder %s227_s14, %s227_s14 }
  0x18   :  { %189 = vmatprep.subr.bf16.mxu0 %v256_v0  ;;  %v169_v21 = vld [vmem:[%s330_s2 + $0x3] ss:$0 sm:$0xff] }
  0x19   :  { %p234_p11 = por %p233_p10, %p232_p9 }
  0x1b   :  { %191 = vmatpush3.bf16.msra.mxu0 %v190_v9  ;;  %p235_p12 = pnand %p234_p11, %p228_p8 }
  0x1e   :  { %184 = vmatmul.mubr.msk.f32.vlgmr.msra.gmra.mrb[0].mxu0 %vm67_vm1, %v32_v10 }
  0x95   :  { %v45_v12 = vpop.permute.xlu0 %44 }
  0x96   :  { %v51_v13 = vmul.f32 %v164_v11, %v45_v12  ;;  %v146_v25 = vmul.f32 %v169_v21, %v45_v12 }
  0x98   :  { %v56_v15 = vadd.f32 %v165_v14, %v51_v13 }
  0x9a   :  { %v166_v16 = vmul.f32 -1.442695, %v56_v15 }
  0x9c   :  { %201 = vpow2.f32 %v166_v16 }
  0xa6   :  { %v202_v17 = vpop.eup %201 }
  0xa7   :  { %v60_v18 = vadd.f32 1.0, %v202_v17 }
  0xa9   :  { %203 = vrcp.f32 %v60_v18 }
  0xb3   :  { %v204_v20 = vpop.eup %203 }
  0xf1   :  { %v137_v22 = vpop.f32.mrb[0].mxu0 }
  0xf2   :  { %v138_v23 = vadd.f32 %v167_v19, %v137_v22  ;;  %v185_v24 = vpop.f32.mrb[1].mxu0 }
  0xf4   :  { %v141_v26 = vmul.f32 %v204_v20, %v138_v23 }
  0xf6   :  { %v147_v27 = vadd.f32 %v146_v25, %v141_v26 }
  0xf8   :  { %148 = vst [vmem:[#allocation5] sm:$0xff] %v147_v27 }
  0xf9   :  { %238 = shalt.err (!%p235_p12)
}
  0xfa   :  { %s239_s2 = scalar_lea.hbm %s332_s4, 128 }
  0xfb   :  { %p240_p13 = scmp.ne.s32.totalorder %s332_s4, %s239_s2  ;;  %p243_p0 = scmp.lt.u32.totalorder %s239_s2, %s332_s4 }
  0xfd   :  { %p245_p1 = pnand %p243_p0, %p240_p13 }
  0xff   :  { %248 = shalt.err (!%p245_p1)
}
 0x100   :  { %158 = dma.vmem_to_hbm [thread:$0]  %s156_s13, 128, %s332_s4, [#allocation4]  }
 0x101   :  { %251 = dma.done.wait [#allocation4], 128  }
 0x102   :  { %252 = vsyncadd [#allocation4], 4294967168 }
 0x103   :  { %162 = vsyncpa [#allocation3], 1 }
 0x104   :  { %163 = vsyncpa [#allocation4], 1 }

</bundles_post_ra>
